<compile_context>
chip_gen: v5e
topology: v5e:2x2
jax: 0.10.0
libtpu: 0.0.40
codegen_flags: <defaults>
</compile_context>

<pallas_src>
import jax
import jax.numpy as jnp
from jax.experimental import pallas as pl
from jax.experimental.pallas import tpu as pltpu


def _blend_kernel(swap_ref, mask_ref, att_ref, out_ref):
    # Blocks: swap/att/out -> (1, C, ...); mask -> (1, Cm, ...) with Cm in {1, C}.
    swap = swap_ref[...].astype(jnp.float32)
    att = att_ref[...].astype(jnp.float32)
    mask = mask_ref[...].astype(jnp.float32)
    # Alpha blend in FMA form; mask broadcasts over the channel dim in-register.
    out_ref[...] = (att + mask * (swap - att)).astype(out_ref.dtype)


# Below this element count the pallas_call launch/step overhead dwarfs the
# actual HBM copy time; let XLA fuse the blend instead.
_PALLAS_MIN_ELEMS = 1 << 16

# Budget for the double-buffered VMEM working set (all 4 arrays, both buffers).
# Kept well under the scoped-VMEM limit on v5e/v6e/v7x.
_VMEM_WORKSET_BYTES = 16 * 1024 * 1024
_VMEM_LIMIT_BYTES = 32 * 1024 * 1024


def blend(swap, mask, att_img, *, force_pallas=False):
    """swap, att_img: (N, C, H, W); mask: (N, 1, H, W) or (N, C, H, W)."""
    n, c, h, w = swap.shape
    hw = h * w
    out_dtype = swap.dtype
    mc = mask.shape[1]  # 1 (broadcast over C in-kernel) or C

    if not force_pallas and swap.size < _PALLAS_MIN_ELEMS:
        # Tiny input: fused XLA expression beats kernel launch overhead.
        m = mask.astype(jnp.float32)
        out = att_img.astype(jnp.float32) + m * (
            swap.astype(jnp.float32) - att_img.astype(jnp.float32)
        )
        return out.astype(out_dtype)

    out_itemsize = jnp.dtype(out_dtype).itemsize
    bytes_accessed = (
        swap.size * swap.dtype.itemsize
        + att_img.size * att_img.dtype.itemsize
        + mask.size * mask.dtype.itemsize
        + n * c * hw * out_itemsize
    )
    cost = pl.CostEstimate(
        flops=3 * n * c * hw, transcendentals=0, bytes_accessed=bytes_accessed
    )
    cparams = pltpu.CompilerParams(
        dimension_semantics=("parallel", "parallel"),
        vmem_limit_bytes=_VMEM_LIMIT_BYTES,
    )

    if hw % 128 == 0:
        # Preferred path: (N, C, R, 128) — lane dim exactly 128 (unmasked
        # stores), sublane rows tiled densely, long contiguous DMA runs.
        r = hw // 128
        swap_r = swap.reshape(n, c, r, 128)
        att_r = att_img.reshape(n, c, r, 128)
        mask_r = mask.reshape(n, mc, r, 128)

        bytes_per_row = 128 * (
            c * swap.dtype.itemsize
            + c * att_img.dtype.itemsize
            + mc * mask.dtype.itemsize
            + c * out_itemsize
        )
        # Rows per block: as big as the double-buffered budget allows, in
        # multiples of 8 (dense sublanes); full extent if the image fits.
        tr_cap = max(8, (_VMEM_WORKSET_BYTES // (2 * bytes_per_row)) // 8 * 8)
        tr = r if r <= tr_cap else tr_cap
        grid = (n, pl.cdiv(r, tr))

        img_spec = pl.BlockSpec((1, c, tr, 128), lambda i, j: (i, 0, j, 0))
        msk_spec = pl.BlockSpec((1, mc, tr, 128), lambda i, j: (i, 0, j, 0))

        out_r = pl.pallas_call(
            _blend_kernel,
            out_shape=jax.ShapeDtypeStruct((n, c, r, 128), out_dtype),
            grid=grid,
            in_specs=[img_spec, msk_spec, img_spec],
            out_specs=img_spec,
            compiler_params=cparams,
            cost_estimate=cost,
        )(swap_r, mask_r, att_r)
        return out_r.reshape(n, c, h, w)

    # Fallback path (H*W not a multiple of 128): (N, C, H*W) lane-dense slabs.
    swap3 = swap.reshape(n, c, hw)
    att3 = att_img.reshape(n, c, hw)
    mask3 = mask.reshape(n, mc, hw)

    bytes_per_lane = (
        c * swap.dtype.itemsize
        + c * att_img.dtype.itemsize
        + mc * mask.dtype.itemsize
        + c * out_itemsize
    )
    tl_cap = max(128, (_VMEM_WORKSET_BYTES // (2 * bytes_per_lane)) // 128 * 128)
    # Full extent if it fits (always legal even when not a multiple of 128);
    # otherwise a large multiple-of-128 tile (Pallas masks the ragged tail).
    tl = hw if hw <= tl_cap else tl_cap
    grid = (n, pl.cdiv(hw, tl))

    img_spec = pl.BlockSpec((1, c, tl), lambda i, j: (i, 0, j))
    msk_spec = pl.BlockSpec((1, mc, tl), lambda i, j: (i, 0, j))

    out3 = pl.pallas_call(
        _blend_kernel,
        out_shape=jax.ShapeDtypeStruct((n, c, hw), out_dtype),
        grid=grid,
        in_specs=[img_spec, msk_spec, img_spec],
        out_specs=img_spec,
        compiler_params=cparams,
        cost_estimate=cost,
    )(swap3, mask3, att3)
    return out3.reshape(n, c, h, w)


if __name__ == "__main__":
    key = jax.random.PRNGKey(0)
    k1, k2, k3 = jax.random.split(key, 3)

    N, C, H, W = 2, 3, 16, 16
    swap = jax.random.normal(k1, (N, C, H, W), dtype=jnp.float32)
    att_img = jax.random.normal(k2, (N, C, H, W), dtype=jnp.float32)
    # mask in [0, 1], single channel (broadcast over C)
    mask = jax.nn.sigmoid(jax.random.normal(k3, (N, 1, H, W), dtype=jnp.float32))

    ref = mask * swap + (1.0 - mask) * att_img

    # 1) Pallas path (forced: the demo shape is below the dispatch threshold).
    out = jax.block_until_ready(blend(swap, mask, att_img, force_pallas=True))
    assert out.shape == (N, C, H, W) and out.dtype == swap.dtype
    assert jnp.allclose(out, ref, atol=1e-5), "pallas f32 mismatch vs reference"

    # 2) Size-based dispatch path (tiny input -> fused XLA expression).
    out_small = jax.block_until_ready(blend(swap, mask, att_img))
    assert jnp.allclose(out_small, ref, atol=1e-5), "dispatch mismatch vs reference"

    # 3) bf16 end-to-end through the Pallas kernel (native dtype kept in HBM).
    swap_bf = swap.astype(jnp.bfloat16)
    att_bf = att_img.astype(jnp.bfloat16)
    mask_bf = mask.astype(jnp.bfloat16)
    out_bf = jax.block_until_ready(blend(swap_bf, mask_bf, att_bf, force_pallas=True))
    assert out_bf.dtype == jnp.bfloat16
    assert jnp.allclose(
        out_bf.astype(jnp.float32), ref, atol=5e-2
    ), "pallas bf16 mismatch vs reference"

    # 4) Full-channel mask (mask shaped like the images) through the Pallas path.
    mask_c = jnp.broadcast_to(mask, (N, C, H, W))
    out_c = jax.block_until_ready(blend(swap, mask_c, att_img, force_pallas=True))
    assert jnp.allclose(out_c, ref, atol=1e-5), "pallas full-C mask mismatch"

    print("KERNEL_OK")
</pallas_src>

<mosaic_0001>
module attributes {stable_mosaic.version = 11 : i64} {
  func.func @_blend_kernel(%arg0: i32, %arg1: i32, %arg2: memref<1x3x2x128xf32, #tpu.memory_space<vmem>>, %arg3: memref<1x1x2x128xf32, #tpu.memory_space<vmem>>, %arg4: memref<1x3x2x128xf32, #tpu.memory_space<vmem>>, %arg5: memref<1x3x2x128xf32, #tpu.memory_space<vmem>>) attributes {dimension_semantics = [#tpu.dimension_semantics<parallel>, #tpu.dimension_semantics<parallel>], iteration_bounds = array<i64: 2, 1>, scalar_prefetch = 0 : i64, scratch_operands = 0 : i64, tpu.core_type = #tpu.core_type<tc>, window_params = [{transform_indices = @transform_0, window_bounds = array<i64: 1, 3, 2, 128>}, {transform_indices = @transform_1, window_bounds = array<i64: 1, 1, 2, 128>}, {transform_indices = @transform_2, window_bounds = array<i64: 1, 3, 2, 128>}, {transform_indices = @transform_3, window_bounds = array<i64: 1, 3, 2, 128>}]} {
    %c0 = arith.constant 0 : index
    %c0_0 = arith.constant 0 : index
    %c0_1 = arith.constant 0 : index
    %c0_2 = arith.constant 0 : index
    %0 = vector.load %arg2[%c0, %c0_0, %c0_1, %c0_2] : memref<1x3x2x128xf32, #tpu.memory_space<vmem>>, vector<1x3x2x128xf32>
    %c0_3 = arith.constant 0 : index
    %c0_4 = arith.constant 0 : index
    %c0_5 = arith.constant 0 : index
    %c0_6 = arith.constant 0 : index
    %1 = vector.load %arg4[%c0_3, %c0_4, %c0_5, %c0_6] : memref<1x3x2x128xf32, #tpu.memory_space<vmem>>, vector<1x3x2x128xf32>
    %c0_7 = arith.constant 0 : index
    %c0_8 = arith.constant 0 : index
    %c0_9 = arith.constant 0 : index
    %c0_10 = arith.constant 0 : index
    %2 = vector.load %arg3[%c0_7, %c0_8, %c0_9, %c0_10] : memref<1x1x2x128xf32, #tpu.memory_space<vmem>>, vector<1x1x2x128xf32>
    %3 = arith.subf %0, %1 : vector<1x3x2x128xf32>
    %4 = vector.broadcast %2 : vector<1x1x2x128xf32> to vector<1x3x2x128xf32>
    %5 = arith.mulf %4, %3 : vector<1x3x2x128xf32>
    %6 = arith.addf %1, %5 : vector<1x3x2x128xf32>
    %c0_11 = arith.constant 0 : index
    %c0_12 = arith.constant 0 : index
    %c0_13 = arith.constant 0 : index
    %c0_14 = arith.constant 0 : index
    %7 = vector.load %arg5[%c0_11, %c0_12, %c0_13, %c0_14] : memref<1x3x2x128xf32, #tpu.memory_space<vmem>>, vector<1x3x2x128xf32>
    tpu.vector_store %arg5[%c0_11, %c0_12, %c0_13, %c0_14], %6 {strides = array<i32>} : memref<1x3x2x128xf32, #tpu.memory_space<vmem>>, vector<1x3x2x128xf32>,
    return
  }
  func.func @transform_0(%arg0: i32, %arg1: i32) -> (i32, i32, i32, i32) {
    %c0_i32 = arith.constant 0 : i32
    %c0_i32_0 = arith.constant 0 : i32
    %c0_i32_1 = arith.constant 0 : i32
    return %arg0, %c0_i32, %arg1, %c0_i32_0 : i32, i32, i32, i32
  }
  func.func @transform_1(%arg0: i32, %arg1: i32) -> (i32, i32, i32, i32) {
    %c0_i32 = arith.constant 0 : i32
    %c0_i32_0 = arith.constant 0 : i32
    %c0_i32_1 = arith.constant 0 : i32
    return %arg0, %c0_i32, %arg1, %c0_i32_0 : i32, i32, i32, i32
  }
  func.func @transform_2(%arg0: i32, %arg1: i32) -> (i32, i32, i32, i32) {
    %c0_i32 = arith.constant 0 : i32
    %c0_i32_0 = arith.constant 0 : i32
    %c0_i32_1 = arith.constant 0 : i32
    return %arg0, %c0_i32, %arg1, %c0_i32_0 : i32, i32, i32, i32
  }
  func.func @transform_3(%arg0: i32, %arg1: i32) -> (i32, i32, i32, i32) {
    %c0_i32 = arith.constant 0 : i32
    %c0_i32_0 = arith.constant 0 : i32
    %c0_i32_1 = arith.constant 0 : i32
    return %arg0, %c0_i32, %arg1, %c0_i32_0 : i32, i32, i32, i32
  }
}

</mosaic_0001>

<bundles_post_ra>
// kernel: tpu_custom_call.1
= control target key start
LH: loop header
LB: loop body
LE: loop exit
PB: predicated region body
PF: predicated region fallthrough
CT: control target
= control target key end

     0   :  { %s915_s0 = inlined_call_operand.hbm [shape: f32[2,3,2,128], index: 0, kind: input, shape index: {}]   ;;  %s916_s1 = inlined_call_operand.hbm [shape: f32[2,1,2,128], index: 1, kind: input, shape index: {}]   ;;  %s917_s2 = inlined_call_operand.hbm [shape: f32[2,3,2,128], index: 2, kind: input, shape index: {}]   ;;  %s918_s3 = inlined_call_operand.hbm [shape: f32[2,3,2,128], index: 3, kind: output, shape index: {}]  }
   0x1   :  { %923 = sst [smem:[#allocation16_spill]] %s916_s1 }
   0x2   :  { %8 = vsyncpa [#allocation3], 0 }
   0x3   :  { %10 = vsyncpa [#allocation3 + $0x1], 0 }
   0x4   :  { %11 = vsyncpa [#allocation6], 0 }
   0x5   :  { %13 = vsyncpa [#allocation6 + $0x1], 0 }
   0x6   :  { %14 = vsyncpa [#allocation4], 0 }
   0x7   :  { %16 = vsyncpa [#allocation4 + $0x1], 0  ;;  %s756_s12 = smov 0   ;;  %s758_s13 = smov 0  }
   0x8   :  { %s760_s14 = smov 0   ;;  %s762_s15 = smov 0  }
   0x9   :  { %s764_s16 = smov 0   ;;  %s766_s17 = smov 0  }
   0xa LB: > { %924 = sst [smem:[#allocation12_spill]] %s718_s14  ;;  %s787_s18 = sadd.s32 4294967295, %s730_s17   ;;  %s730_s17 = sphi %s766_s17, %s22_s17   ;;  %s726_s16 = sphi %s764_s16, %s942_s16   ;;  %s722_s15 = sphi %s762_s15, %s941_s15   ;;  %s718_s14 = sphi %s760_s14, %s937_s14   ;;  %s714_s13 = sphi %s758_s13, %s940_s13   ;;  %s710_s12 = sphi %s756_s12, %s939_s12  }
   0xb   : > { %925 = sst [smem:[#allocation13_spill]] %s730_s17  ;;  %s460_s19 = sadd.s32 4294967294, %s730_s17  }
   0xc   : > { %s34_s20 = sadd.s32 1, %s726_s16  ;;  %s43_s21 = sadd.s32 1, %s718_s14 }
   0xd   : > { %p36_p0 = scmp.ge.s32.totalorder %s34_s20, 2  ;;  %p50_p1 = scmp.ne.s32.totalorder %s718_s14, %s714_s13 }
   0xe   : > { %p51_p2 = scmp.eq.s32.totalorder %s730_s17, 0  ;;  %p56_p3 = scmp.ne.s32.totalorder %s714_s13, %s710_s12 }
   0xf   : > { %s944_s20 = smov (%p36_p0, %s34_s20), 0  ;;  %p57_p5 = scmp.eq.s32.totalorder %s787_s18, 0 }
  0x10   : > { %926 = sst [smem:[#allocation14_spill]] %s944_s20  ;;  %p799_p4 = por %p51_p2, %p50_p1 }
  0x11   : > { %s38_s23 = ssub.s32 %s726_s16, %s944_s20  ;;  %p138_p6 = scmp.eq.s32.totalorder %s787_s18, 1 }
  0x12   : > { %p41_p7 = scmp.eq.s32.totalorder %s38_s23, 0  ;;  %p807_p8 = por %p57_p5, %p56_p3 }
  0x13   : > { %p811_p9 = por %p138_p6, %p50_p1  ;;  %p144_p10 = scmp.eq.s32.totalorder %s460_s19, 1 }
  0x14   : > { %s816_s26 = scalar_select %p41_p7, %s718_s14, %s43_s21  }
  0x15   : > { %p818_p11 = por %p144_p10, %p56_p3  ;;  %p462_p12 = scmp.ge.s32.totalorder %s730_s17, 2 }
  0x16   : > { %930 = sst [smem:[#allocation15_spill]] %s816_s26  ;;  %p500_p13 = scmp.lt.s32.totalorder %s730_s17, 2 }
  0x17   : > { %s825_s28 = sand.u32 1, %s718_s14   ;;  %s187_s30 = sand.u32 1, %s730_s17  }
  0x18   : > { %s472_s29 = smul.u32 6, %s825_s28  ;;  %p831_p0 = pnand %p500_p13, %p799_p4 }
  0x19   : > { %s464_s5 = sshll.u32 %s825_s28, 1  ;;  %s465_s6 = sshll.u32 %s726_s16, 1 }
  0x1a   : > { %s933_s1 = sld [smem:[#allocation16_spill]]  ;;  %s191_s10 = scalar_lea.vmem [#allocation5], %s464_s5 }
  0x1b   : > { %s200_s11 = sshll.u32 %s191_s10, 4  ;;  %s188_s21 = scalar_lea.sflag [#allocation6], %s187_s30  ;;  %s201_s11 = int_to_ptr.vmem [resolvable:$true] %s200_s11 }
  0x1c   : > { %s211_s22 = scalar_lea.vmem [#allocation7], %s472_s29  ;;  %p467_p1 = scmp.ge.s32.totalorder %s730_s17, 1 }
  0x1d   : > { %s220_s23 = sshll.u32 %s211_s22, 4  ;;  %p228_p2 = scmp.lt.s32.totalorder %s730_s17, 3  ;;  %s221_s23 = int_to_ptr.vmem [resolvable:$true] %s220_s23 }
  0x1e   : > { %s473_s5 = smul.u32 6, %s726_s16  ;;  %s732_s26 = smov 32  }
  0x1f   : > { %p844_p3 = pnand %p467_p1, %p228_p2  ;;  %s733_s14 = smov 2  }
  0x20   : > { %s196_s9 = scalar_lea.hbm %s933_s1, %s465_s6  ;;  %s168_s6 = scalar_lea.vmem [#allocation2], %s472_s29 }
  0x21   : > { %s198_s19 = sshll.u32 %s196_s9, 4  ;;  %s177_s7 = sshll.u32 %s168_s6, 4  ;;  %s199_s19 = int_to_ptr.hbm [resolvable:$true] %s198_s19  ;;  %s178_s7 = int_to_ptr.vmem [resolvable:$true] %s177_s7 }
  0x22   : > { %492 = dma.hbm_to_vmem [thread:$0]  (!%p831_p0), %s199_s19, 32, %s201_s11, %s188_s21  }
  0x23   : > { %s174_s30 = scalar_lea.hbm %s915_s0, %s473_s5  ;;  %s217_s22 = scalar_lea.hbm %s917_s2, %s473_s5 }
  0x24   : > { %s175_s10 = sshll.u32 %s174_s30, 4  ;;  %s165_s1 = scalar_lea.sflag [#allocation3], %s825_s28  ;;  %s176_s10 = int_to_ptr.hbm [resolvable:$true] %s175_s10 }
  0x25   : > { %489 = dma.hbm_to_vmem [thread:$0]  (!%p831_p0), %s176_s10, 96, %s178_s7, %s165_s1, %s732_s26, %s732_s26, %s733_s14  }
  0x26   : > { %s218_s17 = sshll.u32 %s217_s22, 4  ;;  %232 = sbr.rel (%p844_p3) target bundleno = 66 (0x42), region = 32  ;;  %s219_s17 = int_to_ptr.hbm [resolvable:$true] %s218_s17 }
  0x27   : > { %495 = dma.hbm_to_vmem [thread:$0]  (!%p831_p0), %s219_s17, 96, %s221_s23, %s188_s21, %s732_s26, %s732_s26, %s733_s14  }
  0x28   : > { %s863_s29 = sand.u32 (!%p844_p3), 1, %s714_s13  }
  0x29   : > { %s476_s6 = smul.u32 (!%p844_p3), 6, %s863_s29  ;;  %s235_s5 = scalar_lea.sflag (!%p844_p3), [#allocation3], %s863_s29 }
  0x2b   : > { %s238_s28 = scalar_lea.vmem [#allocation2], %s476_s6 }
  0x2c   : > { %697 = dma.done.wait (%p807_p8), %s235_s5, 96  }
  0x2d   : > { %699 = vsyncadd (%p807_p8), %s235_s5, 4294967200  ;;  %s244_s1 = sand.u32 1, %s787_s18   ;;  %s468_s14 = sshll.u32 %s863_s29, 1 }
  0x2e   : > { %s245_s17 = scalar_lea.sflag [#allocation6], %s244_s1  ;;  %s248_s20 = scalar_lea.vmem [#allocation5], %s468_s14 }
  0x2f   : > { %701 = dma.done.wait (%p807_p8), %s245_s17, 128  }
  0x30   : > { %703 = vsyncadd (%p807_p8), %s245_s17, 4294967168  ;;  %s477_s26 = smul.u32 6, %s722_s15  ;;  %v292_v0 = vld [vmem:[%s238_s28] sm:$0x3]  ;;  %s258_s4 = scalar_lea.vmem [#allocation7], %s476_s6 }
  0x31   : > { %v295_v1 = vld [vmem:[%s258_s4] sm:$0x3]  ;;  %v298_v2 = vld [vmem:[%s248_s20] sm:$0x3]  ;;  %v293_v4 = vld [vmem:[%s238_s28 + $0x2] sm:$0x3] }
  0x32   : > { %v299_v3 = vsub.f32 %v292_v0, %v295_v1  ;;  %v296_v5 = vld [vmem:[%s258_s4 + $0x2] sm:$0x3]  ;;  %v294_v6 = vld [vmem:[%s238_s28 + $0x4] sm:$0x3]  ;;  %s324_s23 = scalar_lea.hbm %s918_s3, %s477_s26  ;;  %v297_v8 = vld [vmem:[%s258_s4 + $0x4] sm:$0x3] }
  0x33   : > { %v300_v7 = vsub.f32 %v293_v4, %v296_v5  ;;  %s291_s24 = scalar_lea.vmem [#allocation8], %s476_s6  ;;  %v301_v10 = vsub.f32 %v294_v6, %v297_v8  ;;  %s327_s15 = sshll.u32 %s324_s23, 4  ;;  %s328_s15 = int_to_ptr.hbm [resolvable:$true] %s327_s15 }
  0x34   : > { %v302_v9 = vmul.f32 %v299_v3, %v298_v2  ;;  %s325_s7 = sshll.u32 %s291_s24, 4  ;;  %s312_s8 = scalar_lea.sflag [#allocation4], %s863_s29  ;;  %s326_s7 = int_to_ptr.vmem [resolvable:$true] %s325_s7 }
  0x35   : > { %v303_v11 = vmul.f32 %v300_v7, %v298_v2  ;;  %v304_v13 = vmul.f32 %v301_v10, %v298_v2  ;;  %s658_s9 = sshra.s32 %s328_s15, 4  ;;  %s664_s19 = scalar_lea.hbm %s918_s3, 12  ;;  %s659_s9 = int_to_ptr.hbm [resolvable:$true] %s658_s9 }
  0x36   : > { %v305_v12 = vadd.f32 %v302_v9, %v295_v1  ;;  %s660_s30 = scalar_lea.hbm %s659_s9, 6  ;;  %p665_p7 = scmp.lt.s32.totalorder %s659_s9, %s918_s3 }
  0x37   : > { %v306_v14 = vadd.f32 %v303_v11, %v296_v5  ;;  %v307_v15 = vadd.f32 %v304_v13, %v297_v8  ;;  %p661_p4 = scmp.ne.s32.totalorder %s659_s9, %s660_s30  ;;  %p666_p8 = scmp.lt.s32.totalorder %s664_s19, %s660_s30 }
  0x38   : > { %308 = vst [vmem:[%s291_s24] sm:$0x3] %v305_v12 }
  0x39   : > { %309 = vst [vmem:[%s291_s24 + $0x2] sm:$0x3] %v306_v14  ;;  %p662_p5 = pnand %p661_p4, %p811_p9  ;;  %p667_p10 = por %p666_p8, %p665_p7 }
  0x3a   : > { %310 = vst [vmem:[%s291_s24 + $0x4] sm:$0x3] %v307_v15 }
  0x3b   : > { %p663_p6 = pneg %p662_p5 }
  0x3d   : > { %p668_p13 = pnand %p667_p10, %p663_p6 }
  0x3f   : > { %671 = shalt.err (!%p668_p13)
}
  0x40   : > { %s734_s29 = smov 32   ;;  %s735_s5 = smov 2  }
  0x41   : > { %484 = dma.vmem_to_hbm [thread:$0]  (%p811_p9), %s326_s7, 96, %s328_s15, %s312_s8, %s734_s29, %s734_s29, %s735_s5  }
  0x42 PF: > { %s935_s28 = sld [smem:[#allocation13_spill]]  ;;  %s342_s1 = sand.u32 1, %s710_s12  }
  0x43   : > { %p497_p0 = pnand %p462_p12, %p818_p11  ;;  %s343_s14 = scalar_lea.sflag [#allocation4], %s342_s1 }
  0x45   : > { %p498_p1 = pneg %p497_p0 }
  0x47   : > { %705 = dma.done.wait (%p498_p1), %s343_s14, 96  }
  0x48   : > { %707 = vsyncadd (%p498_p1), %s343_s14, 4294967200  ;;  %s22_s17 = sadd.s32 1, %s935_s28   ;;  %s936_s20 = sld [smem:[#allocation12_spill]] }
  0x49   : > { %p19_p2 = scmp.ge.s32.totalorder %s22_s17, 4   ;;  %s937_s14 = sld [smem:[#allocation15_spill]] }
  0x4a   : > { %s938_s25 = sld [smem:[#allocation14_spill]]  ;;  %s939_s12 = smov %s714_s13 }
  0x4b   : > { %s941_s15 = smov %s726_s16 }
  0x4c   :  { %21 = sbr.rel (!%p19_p2) target bundleno = 10 (0xa), region = 101 }
  0x4e   : > { %s940_s13 = smov %s936_s20 }
  0x50   : > { %s942_s16 = smov %s938_s25 }
  0x51   :  { %349 = vsyncpa [#allocation3], 1 }
  0x52   :  { %351 = vsyncpa [#allocation3 + $0x1], 1 }
  0x53   :  { %352 = vsyncpa [#allocation6], 1 }
  0x54   :  { %354 = vsyncpa [#allocation6 + $0x1], 1 }
  0x55   :  { %355 = vsyncpa [#allocation4], 1 }
  0x56   :  { %357 = vsyncpa [#allocation4 + $0x1], 1 }

</bundles_post_ra>
